<compile_context>
chip_gen: v6e
topology: v6e:2x2x1
jax: 0.10.0
libtpu: 0.0.40
codegen_flags: <defaults>
</compile_context>

<pallas_src>
import math
from functools import partial

import jax
import jax.numpy as jnp
from jax import lax
from jax.experimental import pallas as pl
from jax.experimental.pallas import tpu as pltpu


# ---------------------------------------------------------------------------
# Pallas kernel: fused QKV projection + per-head attention + output projection
# (one batch element per grid step)
# ---------------------------------------------------------------------------
def _attention_kernel(x_ref, wq_ref, wk_ref, wv_ref, wo_ref,
                      bq_ref, bk_ref, bv_ref, bo_ref, out_ref,
                      *, num_heads: int, head_dim: int):
    x = x_ref[0].astype(jnp.float32)                 # (S, D)
    scale = 1.0 / math.sqrt(head_dim)                # compile-time constant

    # Q/K/V projections on the MXU with f32 accumulation.
    q = jnp.dot(x, wq_ref[...], preferred_element_type=jnp.float32) + bq_ref[...]
    k = jnp.dot(x, wk_ref[...], preferred_element_type=jnp.float32) + bk_ref[...]
    v = jnp.dot(x, wv_ref[...], preferred_element_type=jnp.float32) + bv_ref[...]

    wo = wo_ref[...]                                 # (D, D), loaded once
    s_len, d = x.shape
    acc = jnp.zeros((s_len, d), dtype=jnp.float32)

    # Statically unrolled per-head attention.
    for h in range(num_heads):
        sl = slice(h * head_dim, (h + 1) * head_dim)
        qh = q[:, sl]                                # (S, hd)
        kh = k[:, sl]                                # (S, hd)
        vh = v[:, sl]                                # (S, hd)

        # scores = qh @ kh^T / sqrt(hd)   (contraction over head_dim)
        scores = lax.dot_general(
            qh, kh, (((1,), (1,)), ((), ())),
            preferred_element_type=jnp.float32) * scale          # (S, S)

        # Numerically-stable softmax over keys.
        m = jnp.max(scores, axis=-1, keepdims=True)
        e = jnp.exp(scores - m)
        p = e / jnp.sum(e, axis=-1, keepdims=True)

        # context_h = p @ vh ; fold output projection per head (no concat).
        ctx_h = jnp.dot(p, vh, preferred_element_type=jnp.float32)        # (S, hd)
        acc = acc + jnp.dot(ctx_h, wo[sl, :], preferred_element_type=jnp.float32)

    out_ref[0] = (acc + bo_ref[...]).astype(out_ref.dtype)


# ---------------------------------------------------------------------------
# Wrapper
# ---------------------------------------------------------------------------
def attention_forward(x, params, *, num_heads: int):
    """Pallas equivalent of AttentionLayer.forward (mask=None, eval mode).

    Args:
      x: (B, S, D) float32.
      params: dict with PyTorch-layout weights wq/wk/wv/wo of shape (D, D)
              (out_features, in_features) and biases bq/bk/bv/bo of shape (D,).
    Returns:
      (B, S, D) output.
    """
    B, S, D = x.shape
    assert D % num_heads == 0, "input_dim must be divisible by num_heads"
    head_dim = D // num_heads

    # Pre-transpose linear weights so the kernel does plain x @ W.
    wq_t = params["wq"].T.astype(jnp.float32)
    wk_t = params["wk"].T.astype(jnp.float32)
    wv_t = params["wv"].T.astype(jnp.float32)
    wo_t = params["wo"].T.astype(jnp.float32)
    bq = params["bq"].reshape(1, D).astype(jnp.float32)
    bk = params["bk"].reshape(1, D).astype(jnp.float32)
    bv = params["bv"].reshape(1, D).astype(jnp.float32)
    bo = params["bo"].reshape(1, D).astype(jnp.float32)

    kernel = partial(_attention_kernel, num_heads=num_heads, head_dim=head_dim)

    weight_spec = pl.BlockSpec((D, D), lambda b: (0, 0))
    bias_spec = pl.BlockSpec((1, D), lambda b: (0, 0))

    out = pl.pallas_call(
        kernel,
        grid=(B,),
        in_specs=[
            pl.BlockSpec((1, S, D), lambda b: (b, 0, 0)),   # x
            weight_spec, weight_spec, weight_spec, weight_spec,
            bias_spec, bias_spec, bias_spec, bias_spec,
        ],
        out_specs=pl.BlockSpec((1, S, D), lambda b: (b, 0, 0)),
        out_shape=jax.ShapeDtypeStruct((B, S, D), x.dtype),
        compiler_params=pltpu.CompilerParams(
            dimension_semantics=("parallel",),
        ),
    )(x.astype(jnp.float32), wq_t, wk_t, wv_t, wo_t, bq, bk, bv, bo)
    return out


class AttentionLayerPallas:
    """JAX/Pallas counterpart of the PyTorch AttentionLayer (inference)."""

    def __init__(self, input_dim: int, num_heads: int = 4, dropout: float = 0.1,
                 *, key):
        assert input_dim % num_heads == 0, "input_dim must be divisible by num_heads"
        self.input_dim = input_dim
        self.num_heads = num_heads
        self.head_dim = input_dim // num_heads
        self.dropout = dropout  # identity at inference

        ks = jax.random.split(key, 8)
        scale = 1.0 / math.sqrt(input_dim)
        def w(k):
            return jax.random.uniform(k, (input_dim, input_dim), jnp.float32,
                                      -scale, scale)
        def b(k):
            return jax.random.uniform(k, (input_dim,), jnp.float32, -scale, scale)
        self.params = {
            "wq": w(ks[0]), "bq": b(ks[1]),
            "wk": w(ks[2]), "bk": b(ks[3]),
            "wv": w(ks[4]), "bv": b(ks[5]),
            "wo": w(ks[6]), "bo": b(ks[7]),
        }

    def __call__(self, x, mask=None):
        if mask is not None:
            # TODO(synk): masked_fill path not implemented in the Pallas kernel.
            raise NotImplementedError("mask is not supported in this Pallas port")
        return attention_forward(x, self.params, num_heads=self.num_heads)


# ---------------------------------------------------------------------------
# Pure-JAX reference (mirrors the PyTorch forward) for a correctness check
# ---------------------------------------------------------------------------
def _reference(x, params, num_heads):
    B, S, D = x.shape
    hd = D // num_heads

    def linear(t, w, b):  # PyTorch nn.Linear: y = t @ W^T + b, W is (out, in)
        return jnp.einsum("bsd,od->bso", t, w) + b

    q = linear(x, params["wq"], params["bq"]).reshape(B, S, num_heads, hd).transpose(0, 2, 1, 3)
    k = linear(x, params["wk"], params["bk"]).reshape(B, S, num_heads, hd).transpose(0, 2, 1, 3)
    v = linear(x, params["wv"], params["bv"]).reshape(B, S, num_heads, hd).transpose(0, 2, 1, 3)

    scores = jnp.einsum("bhqd,bhkd->bhqk", q, k) / math.sqrt(hd)
    attn = jax.nn.softmax(scores, axis=-1)
    ctx = jnp.einsum("bhqk,bhkd->bhqd", attn, v)
    ctx = ctx.transpose(0, 2, 1, 3).reshape(B, S, D)
    return jnp.einsum("bsd,od->bso", ctx, params["wo"]) + params["bo"]


if __name__ == "__main__":
    key = jax.random.PRNGKey(0)
    k_layer, k_x = jax.random.split(key)

    B, S, D, H = 2, 8, 32, 4
    layer = AttentionLayerPallas(input_dim=D, num_heads=H, dropout=0.1, key=k_layer)
    x = jax.random.normal(k_x, (B, S, D), dtype=jnp.float32)

    out = layer(x)
    out = jax.block_until_ready(out)

    ref = _reference(x, layer.params, H)
    assert out.shape == (B, S, D)
    assert jnp.allclose(out, ref, atol=1e-4, rtol=1e-4), (
        f"max abs err = {jnp.max(jnp.abs(out - ref))}")

    print("KERNEL_OK")
</pallas_src>

<mosaic_0001>
module attributes {stable_mosaic.version = 11 : i64} {
  func.func @_attention_kernel(%arg0: i32, %arg1: memref<1x8x32xf32, #tpu.memory_space<vmem>>, %arg2: memref<32x32xf32, #tpu.memory_space<vmem>>, %arg3: memref<32x32xf32, #tpu.memory_space<vmem>>, %arg4: memref<32x32xf32, #tpu.memory_space<vmem>>, %arg5: memref<32x32xf32, #tpu.memory_space<vmem>>, %arg6: memref<1x32xf32, #tpu.memory_space<vmem>>, %arg7: memref<1x32xf32, #tpu.memory_space<vmem>>, %arg8: memref<1x32xf32, #tpu.memory_space<vmem>>, %arg9: memref<1x32xf32, #tpu.memory_space<vmem>>, %arg10: memref<1x8x32xf32, #tpu.memory_space<vmem>>) attributes {dimension_semantics = [#tpu.dimension_semantics<parallel>], iteration_bounds = array<i64: 2>, scalar_prefetch = 0 : i64, scratch_operands = 0 : i64, tpu.core_type = #tpu.core_type<tc>, window_params = [{transform_indices = @transform_0, window_bounds = array<i64: 1, 8, 32>}, {pipeline_mode = #tpu.pipeline_mode<synchronous>, transform_indices = @transform_1, window_bounds = array<i64: 32, 32>}, {pipeline_mode = #tpu.pipeline_mode<synchronous>, transform_indices = @transform_2, window_bounds = array<i64: 32, 32>}, {pipeline_mode = #tpu.pipeline_mode<synchronous>, transform_indices = @transform_3, window_bounds = array<i64: 32, 32>}, {pipeline_mode = #tpu.pipeline_mode<synchronous>, transform_indices = @transform_4, window_bounds = array<i64: 32, 32>}, {pipeline_mode = #tpu.pipeline_mode<synchronous>, transform_indices = @transform_5, window_bounds = array<i64: 1, 32>}, {pipeline_mode = #tpu.pipeline_mode<synchronous>, transform_indices = @transform_6, window_bounds = array<i64: 1, 32>}, {pipeline_mode = #tpu.pipeline_mode<synchronous>, transform_indices = @transform_7, window_bounds = array<i64: 1, 32>}, {pipeline_mode = #tpu.pipeline_mode<synchronous>, transform_indices = @transform_8, window_bounds = array<i64: 1, 32>}, {transform_indices = @transform_9, window_bounds = array<i64: 1, 8, 32>}]} {
    %c0 = arith.constant 0 : index
    %c0_0 = arith.constant 0 : index
    %c0_1 = arith.constant 0 : index
    %0 = vector.load %arg1[%c0, %c0_0, %c0_1] : memref<1x8x32xf32, #tpu.memory_space<vmem>>, vector<1x8x32xf32>
    %1 = vector.shape_cast %0 : vector<1x8x32xf32> to vector<8x32xf32>
    %c0_2 = arith.constant 0 : index
    %c0_3 = arith.constant 0 : index
    %2 = vector.load %arg2[%c0_2, %c0_3] : memref<32x32xf32, #tpu.memory_space<vmem>>, vector<32x32xf32>
    %cst = arith.constant dense<0.000000e+00> : vector<8x32xf32>
    %3 = tpu.matmul %1, %2, %cst {dimension_numbers = #tpu.dot_dimension_numbers<[1], [0], [0], [1], [0, 0, 1, 1], [], []>} : vector<8x32xf32>, vector<32x32xf32>, vector<8x32xf32> -> vector<8x32xf32>
    %c0_4 = arith.constant 0 : index
    %c0_5 = arith.constant 0 : index
    %4 = vector.load %arg6[%c0_4, %c0_5] : memref<1x32xf32, #tpu.memory_space<vmem>>, vector<1x32xf32>
    %5 = vector.broadcast %4 : vector<1x32xf32> to vector<8x32xf32>
    %6 = arith.addf %3, %5 : vector<8x32xf32>
    %c0_6 = arith.constant 0 : index
    %c0_7 = arith.constant 0 : index
    %7 = vector.load %arg3[%c0_6, %c0_7] : memref<32x32xf32, #tpu.memory_space<vmem>>, vector<32x32xf32>
    %cst_8 = arith.constant dense<0.000000e+00> : vector<8x32xf32>
    %8 = tpu.matmul %1, %7, %cst_8 {dimension_numbers = #tpu.dot_dimension_numbers<[1], [0], [0], [1], [0, 0, 1, 1], [], []>} : vector<8x32xf32>, vector<32x32xf32>, vector<8x32xf32> -> vector<8x32xf32>
    %c0_9 = arith.constant 0 : index
    %c0_10 = arith.constant 0 : index
    %9 = vector.load %arg7[%c0_9, %c0_10] : memref<1x32xf32, #tpu.memory_space<vmem>>, vector<1x32xf32>
    %10 = vector.broadcast %9 : vector<1x32xf32> to vector<8x32xf32>
    %11 = arith.addf %8, %10 : vector<8x32xf32>
    %c0_11 = arith.constant 0 : index
    %c0_12 = arith.constant 0 : index
    %12 = vector.load %arg4[%c0_11, %c0_12] : memref<32x32xf32, #tpu.memory_space<vmem>>, vector<32x32xf32>
    %cst_13 = arith.constant dense<0.000000e+00> : vector<8x32xf32>
    %13 = tpu.matmul %1, %12, %cst_13 {dimension_numbers = #tpu.dot_dimension_numbers<[1], [0], [0], [1], [0, 0, 1, 1], [], []>} : vector<8x32xf32>, vector<32x32xf32>, vector<8x32xf32> -> vector<8x32xf32>
    %c0_14 = arith.constant 0 : index
    %c0_15 = arith.constant 0 : index
    %14 = vector.load %arg8[%c0_14, %c0_15] : memref<1x32xf32, #tpu.memory_space<vmem>>, vector<1x32xf32>
    %15 = vector.broadcast %14 : vector<1x32xf32> to vector<8x32xf32>
    %16 = arith.addf %13, %15 : vector<8x32xf32>
    %c0_16 = arith.constant 0 : index
    %c0_17 = arith.constant 0 : index
    %17 = vector.load %arg5[%c0_16, %c0_17] : memref<32x32xf32, #tpu.memory_space<vmem>>, vector<32x32xf32>
    %cst_18 = arith.constant 0.000000e+00 : f32
    %18 = vector.broadcast %cst_18 : f32 to vector<8x32xf32>
    %19 = vector.extract_strided_slice %6 {offsets = [0, 0], sizes = [8, 8], strides = [1, 1]} : vector<8x32xf32> to vector<8x8xf32>
    %20 = vector.extract_strided_slice %11 {offsets = [0, 0], sizes = [8, 8], strides = [1, 1]} : vector<8x32xf32> to vector<8x8xf32>
    %21 = vector.extract_strided_slice %16 {offsets = [0, 0], sizes = [8, 8], strides = [1, 1]} : vector<8x32xf32> to vector<8x8xf32>
    %cst_19 = arith.constant dense<0.000000e+00> : vector<8x8xf32>
    %22 = tpu.matmul %19, %20, %cst_19 {dimension_numbers = #tpu.dot_dimension_numbers<[1], [1], [0], [0], [0, 0, 1, 0], [], []>} : vector<8x8xf32>, vector<8x8xf32>, vector<8x8xf32> -> vector<8x8xf32>
    %cst_20 = arith.constant 0.353553385 : f32
    %23 = vector.broadcast %cst_20 : f32 to vector<8x8xf32>
    %24 = arith.mulf %22, %23 : vector<8x8xf32>
    %cst_21 = arith.constant dense<0xFF800000> : vector<8xf32>
    %25 = vector.multi_reduction <maximumf>, %24, %cst_21 [1] : vector<8x8xf32> to vector<8xf32>
    %26 = vector.shape_cast %25 : vector<8xf32> to vector<8x1xf32>
    %27 = vector.broadcast %26 : vector<8x1xf32> to vector<8x8xf32>
    %28 = arith.subf %24, %27 : vector<8x8xf32>
    %29 = math.exp %28 : vector<8x8xf32>
    %cst_22 = arith.constant dense<0.000000e+00> : vector<8xf32>
    %30 = vector.multi_reduction <add>, %29, %cst_22 [1] : vector<8x8xf32> to vector<8xf32>
    %31 = vector.shape_cast %30 : vector<8xf32> to vector<8x1xf32>
    %32 = vector.broadcast %31 : vector<8x1xf32> to vector<8x8xf32>
    %33 = arith.divf %29, %32 : vector<8x8xf32>
    %cst_23 = arith.constant dense<0.000000e+00> : vector<8x8xf32>
    %34 = tpu.matmul %33, %21, %cst_23 {dimension_numbers = #tpu.dot_dimension_numbers<[1], [0], [0], [1], [0, 0, 1, 1], [], []>} : vector<8x8xf32>, vector<8x8xf32>, vector<8x8xf32> -> vector<8x8xf32>
    %35 = vector.extract_strided_slice %17 {offsets = [0, 0], sizes = [8, 32], strides = [1, 1]} : vector<32x32xf32> to vector<8x32xf32>
    %cst_24 = arith.constant dense<0.000000e+00> : vector<8x32xf32>
    %36 = tpu.matmul %34, %35, %cst_24 {dimension_numbers = #tpu.dot_dimension_numbers<[1], [0], [0], [1], [0, 0, 1, 1], [], []>} : vector<8x8xf32>, vector<8x32xf32>, vector<8x32xf32> -> vector<8x32xf32>
    %37 = arith.addf %18, %36 : vector<8x32xf32>
    %38 = vector.extract_strided_slice %6 {offsets = [0, 8], sizes = [8, 8], strides = [1, 1]} : vector<8x32xf32> to vector<8x8xf32>
    %39 = vector.extract_strided_slice %11 {offsets = [0, 8], sizes = [8, 8], strides = [1, 1]} : vector<8x32xf32> to vector<8x8xf32>
    %40 = vector.extract_strided_slice %16 {offsets = [0, 8], sizes = [8, 8], strides = [1, 1]} : vector<8x32xf32> to vector<8x8xf32>
    %cst_25 = arith.constant dense<0.000000e+00> : vector<8x8xf32>
    %41 = tpu.matmul %38, %39, %cst_25 {dimension_numbers = #tpu.dot_dimension_numbers<[1], [1], [0], [0], [0, 0, 1, 0], [], []>} : vector<8x8xf32>, vector<8x8xf32>, vector<8x8xf32> -> vector<8x8xf32>
    %cst_26 = arith.constant 0.353553385 : f32
    %42 = vector.broadcast %cst_26 : f32 to vector<8x8xf32>
    %43 = arith.mulf %41, %42 : vector<8x8xf32>
    %cst_27 = arith.constant dense<0xFF800000> : vector<8xf32>
    %44 = vector.multi_reduction <maximumf>, %43, %cst_27 [1] : vector<8x8xf32> to vector<8xf32>
    %45 = vector.shape_cast %44 : vector<8xf32> to vector<8x1xf32>
    %46 = vector.broadcast %45 : vector<8x1xf32> to vector<8x8xf32>
    %47 = arith.subf %43, %46 : vector<8x8xf32>
    %48 = math.exp %47 : vector<8x8xf32>
    %cst_28 = arith.constant dense<0.000000e+00> : vector<8xf32>
    %49 = vector.multi_reduction <add>, %48, %cst_28 [1] : vector<8x8xf32> to vector<8xf32>
    %50 = vector.shape_cast %49 : vector<8xf32> to vector<8x1xf32>
    %51 = vector.broadcast %50 : vector<8x1xf32> to vector<8x8xf32>
    %52 = arith.divf %48, %51 : vector<8x8xf32>
    %cst_29 = arith.constant dense<0.000000e+00> : vector<8x8xf32>
    %53 = tpu.matmul %52, %40, %cst_29 {dimension_numbers = #tpu.dot_dimension_numbers<[1], [0], [0], [1], [0, 0, 1, 1], [], []>} : vector<8x8xf32>, vector<8x8xf32>, vector<8x8xf32> -> vector<8x8xf32>
    %54 = vector.extract_strided_slice %17 {offsets = [8, 0], sizes = [8, 32], strides = [1, 1]} : vector<32x32xf32> to vector<8x32xf32>
    %cst_30 = arith.constant dense<0.000000e+00> : vector<8x32xf32>
    %55 = tpu.matmul %53, %54, %cst_30 {dimension_numbers = #tpu.dot_dimension_numbers<[1], [0], [0], [1], [0, 0, 1, 1], [], []>} : vector<8x8xf32>, vector<8x32xf32>, vector<8x32xf32> -> vector<8x32xf32>
    %56 = arith.addf %37, %55 : vector<8x32xf32>
    %57 = vector.extract_strided_slice %6 {offsets = [0, 16], sizes = [8, 8], strides = [1, 1]} : vector<8x32xf32> to vector<8x8xf32>
    %58 = vector.extract_strided_slice %11 {offsets = [0, 16], sizes = [8, 8], strides = [1, 1]} : vector<8x32xf32> to vector<8x8xf32>
    %59 = vector.extract_strided_slice %16 {offsets = [0, 16], sizes = [8, 8], strides = [1, 1]} : vector<8x32xf32> to vector<8x8xf32>
    %cst_31 = arith.constant dense<0.000000e+00> : vector<8x8xf32>
    %60 = tpu.matmul %57, %58, %cst_31 {dimension_numbers = #tpu.dot_dimension_numbers<[1], [1], [0], [0], [0, 0, 1, 0], [], []>} : vector<8x8xf32>, vector<8x8xf32>, vector<8x8xf32> -> vector<8x8xf32>
    %cst_32 = arith.constant 0.353553385 : f32
    %61 = vector.broadcast %cst_32 : f32 to vector<8x8xf32>
    %62 = arith.mulf %60, %61 : vector<8x8xf32>
    %cst_33 = arith.constant dense<0xFF800000> : vector<8xf32>
    %63 = vector.multi_reduction <maximumf>, %62, %cst_33 [1] : vector<8x8xf32> to vector<8xf32>
    %64 = vector.shape_cast %63 : vector<8xf32> to vector<8x1xf32>
    %65 = vector.broadcast %64 : vector<8x1xf32> to vector<8x8xf32>
    %66 = arith.subf %62, %65 : vector<8x8xf32>
    %67 = math.exp %66 : vector<8x8xf32>
    %cst_34 = arith.constant dense<0.000000e+00> : vector<8xf32>
    %68 = vector.multi_reduction <add>, %67, %cst_34 [1] : vector<8x8xf32> to vector<8xf32>
    %69 = vector.shape_cast %68 : vector<8xf32> to vector<8x1xf32>
    %70 = vector.broadcast %69 : vector<8x1xf32> to vector<8x8xf32>
    %71 = arith.divf %67, %70 : vector<8x8xf32>
    %cst_35 = arith.constant dense<0.000000e+00> : vector<8x8xf32>
    %72 = tpu.matmul %71, %59, %cst_35 {dimension_numbers = #tpu.dot_dimension_numbers<[1], [0], [0], [1], [0, 0, 1, 1], [], []>} : vector<8x8xf32>, vector<8x8xf32>, vector<8x8xf32> -> vector<8x8xf32>
    %73 = vector.extract_strided_slice %17 {offsets = [16, 0], sizes = [8, 32], strides = [1, 1]} : vector<32x32xf32> to vector<8x32xf32>
    %cst_36 = arith.constant dense<0.000000e+00> : vector<8x32xf32>
    %74 = tpu.matmul %72, %73, %cst_36 {dimension_numbers = #tpu.dot_dimension_numbers<[1], [0], [0], [1], [0, 0, 1, 1], [], []>} : vector<8x8xf32>, vector<8x32xf32>, vector<8x32xf32> -> vector<8x32xf32>
    %75 = arith.addf %56, %74 : vector<8x32xf32>
    %76 = vector.extract_strided_slice %6 {offsets = [0, 24], sizes = [8, 8], strides = [1, 1]} : vector<8x32xf32> to vector<8x8xf32>
    %77 = vector.extract_strided_slice %11 {offsets = [0, 24], sizes = [8, 8], strides = [1, 1]} : vector<8x32xf32> to vector<8x8xf32>
    %78 = vector.extract_strided_slice %16 {offsets = [0, 24], sizes = [8, 8], strides = [1, 1]} : vector<8x32xf32> to vector<8x8xf32>
    %cst_37 = arith.constant dense<0.000000e+00> : vector<8x8xf32>
    %79 = tpu.matmul %76, %77, %cst_37 {dimension_numbers = #tpu.dot_dimension_numbers<[1], [1], [0], [0], [0, 0, 1, 0], [], []>} : vector<8x8xf32>, vector<8x8xf32>, vector<8x8xf32> -> vector<8x8xf32>
    %cst_38 = arith.constant 0.353553385 : f32
    %80 = vector.broadcast %cst_38 : f32 to vector<8x8xf32>
    %81 = arith.mulf %79, %80 : vector<8x8xf32>
    %cst_39 = arith.constant dense<0xFF800000> : vector<8xf32>
    %82 = vector.multi_reduction <maximumf>, %81, %cst_39 [1] : vector<8x8xf32> to vector<8xf32>
    %83 = vector.shape_cast %82 : vector<8xf32> to vector<8x1xf32>
    %84 = vector.broadcast %83 : vector<8x1xf32> to vector<8x8xf32>
    %85 = arith.subf %81, %84 : vector<8x8xf32>
    %86 = math.exp %85 : vector<8x8xf32>
    %cst_40 = arith.constant dense<0.000000e+00> : vector<8xf32>
    %87 = vector.multi_reduction <add>, %86, %cst_40 [1] : vector<8x8xf32> to vector<8xf32>
    %88 = vector.shape_cast %87 : vector<8xf32> to vector<8x1xf32>
    %89 = vector.broadcast %88 : vector<8x1xf32> to vector<8x8xf32>
    %90 = arith.divf %86, %89 : vector<8x8xf32>
    %cst_41 = arith.constant dense<0.000000e+00> : vector<8x8xf32>
    %91 = tpu.matmul %90, %78, %cst_41 {dimension_numbers = #tpu.dot_dimension_numbers<[1], [0], [0], [1], [0, 0, 1, 1], [], []>} : vector<8x8xf32>, vector<8x8xf32>, vector<8x8xf32> -> vector<8x8xf32>
    %92 = vector.extract_strided_slice %17 {offsets = [24, 0], sizes = [8, 32], strides = [1, 1]} : vector<32x32xf32> to vector<8x32xf32>
    %cst_42 = arith.constant dense<0.000000e+00> : vector<8x32xf32>
    %93 = tpu.matmul %91, %92, %cst_42 {dimension_numbers = #tpu.dot_dimension_numbers<[1], [0], [0], [1], [0, 0, 1, 1], [], []>} : vector<8x8xf32>, vector<8x32xf32>, vector<8x32xf32> -> vector<8x32xf32>
    %94 = arith.addf %75, %93 : vector<8x32xf32>
    %c0_43 = arith.constant 0 : index
    %c0_44 = arith.constant 0 : index
    %95 = vector.load %arg9[%c0_43, %c0_44] : memref<1x32xf32, #tpu.memory_space<vmem>>, vector<1x32xf32>
    %96 = vector.broadcast %95 : vector<1x32xf32> to vector<8x32xf32>
    %97 = arith.addf %94, %96 : vector<8x32xf32>
    %c0_45 = arith.constant 0 : index
    %c0_46 = arith.constant 0 : index
    %c0_47 = arith.constant 0 : index
    %98 = vector.load %arg10[%c0_45, %c0_46, %c0_47] : memref<1x8x32xf32, #tpu.memory_space<vmem>>, vector<1x8x32xf32>
    %99 = vector.shape_cast %98 : vector<1x8x32xf32> to vector<8x32xf32>
    %100 = vector.shape_cast %97 : vector<8x32xf32> to vector<1x8x32xf32>
    tpu.vector_store %arg10[%c0_45, %c0_46, %c0_47], %100 {strides = array<i32>} : memref<1x8x32xf32, #tpu.memory_space<vmem>>, vector<1x8x32xf32>,
    return
  }
  func.func @transform_0(%arg0: i32) -> (i32, i32, i32) {
    %c0_i32 = arith.constant 0 : i32
    %c0_i32_0 = arith.constant 0 : i32
    %c0_i32_1 = arith.constant 0 : i32
    return %arg0, %c0_i32, %c0_i32_0 : i32, i32, i32
  }
  func.func @transform_1(%arg0: i32) -> (i32, i32) {
    %c0_i32 = arith.constant 0 : i32
    %c0_i32_0 = arith.constant 0 : i32
    %c0_i32_1 = arith.constant 0 : i32
    return %c0_i32, %c0_i32_0 : i32, i32
  }
  func.func @transform_2(%arg0: i32) -> (i32, i32) {
    %c0_i32 = arith.constant 0 : i32
    %c0_i32_0 = arith.constant 0 : i32
    %c0_i32_1 = arith.constant 0 : i32
    return %c0_i32, %c0_i32_0 : i32, i32
  }
  func.func @transform_3(%arg0: i32) -> (i32, i32) {
    %c0_i32 = arith.constant 0 : i32
    %c0_i32_0 = arith.constant 0 : i32
    %c0_i32_1 = arith.constant 0 : i32
    return %c0_i32, %c0_i32_0 : i32, i32
  }
  func.func @transform_4(%arg0: i32) -> (i32, i32) {
    %c0_i32 = arith.constant 0 : i32
    %c0_i32_0 = arith.constant 0 : i32
    %c0_i32_1 = arith.constant 0 : i32
    return %c0_i32, %c0_i32_0 : i32, i32
  }
  func.func @transform_5(%arg0: i32) -> (i32, i32) {
    %c0_i32 = arith.constant 0 : i32
    %c0_i32_0 = arith.constant 0 : i32
    %c0_i32_1 = arith.constant 0 : i32
    return %c0_i32, %c0_i32_0 : i32, i32
  }
  func.func @transform_6(%arg0: i32) -> (i32, i32) {
    %c0_i32 = arith.constant 0 : i32
    %c0_i32_0 = arith.constant 0 : i32
    %c0_i32_1 = arith.constant 0 : i32
    return %c0_i32, %c0_i32_0 : i32, i32
  }
  func.func @transform_7(%arg0: i32) -> (i32, i32) {
    %c0_i32 = arith.constant 0 : i32
    %c0_i32_0 = arith.constant 0 : i32
    %c0_i32_1 = arith.constant 0 : i32
    return %c0_i32, %c0_i32_0 : i32, i32
  }
  func.func @transform_8(%arg0: i32) -> (i32, i32) {
    %c0_i32 = arith.constant 0 : i32
    %c0_i32_0 = arith.constant 0 : i32
    %c0_i32_1 = arith.constant 0 : i32
    return %c0_i32, %c0_i32_0 : i32, i32
  }
  func.func @transform_9(%arg0: i32) -> (i32, i32, i32) {
    %c0_i32 = arith.constant 0 : i32
    %c0_i32_0 = arith.constant 0 : i32
    %c0_i32_1 = arith.constant 0 : i32
    return %arg0, %c0_i32, %c0_i32_0 : i32, i32, i32
  }
}

</mosaic_0001>

<bundles_post_ra>
// kernel: tpu_custom_call.1
= control target key start
LH: loop header
LB: loop body
LE: loop exit
PB: predicated region body
PF: predicated region fallthrough
CT: control target
= control target key end

     0   :  { %s2638_s0 = inlined_call_operand.hbm [shape: f32[2,8,32], index: 0, kind: input, shape index: {}]   ;;  %s2639_s1 = inlined_call_operand.hbm [shape: f32[32,32], index: 1, kind: input, shape index: {}]   ;;  %s2640_s2 = inlined_call_operand.hbm [shape: f32[32,32], index: 2, kind: input, shape index: {}]   ;;  %s2641_s3 = inlined_call_operand.hbm [shape: f32[32,32], index: 3, kind: input, shape index: {}]   ;;  %s2642_s4 = inlined_call_operand.hbm [shape: f32[32,32], index: 4, kind: input, shape index: {}]   ;;  %s2643_s5 = inlined_call_operand.vmem [shape: f32[1,32], index: 5, kind: input, shape index: {}]   ;;  %s2644_s6 = inlined_call_operand.vmem [shape: f32[1,32], index: 6, kind: input, shape index: {}]   ;;  %s2645_s7 = inlined_call_operand.vmem [shape: f32[1,32], index: 7, kind: input, shape index: {}]   ;;  %s2646_s8 = inlined_call_operand.vmem [shape: f32[1,32], index: 8, kind: input, shape index: {}]   ;;  %s2647_s9 = inlined_call_operand.hbm [shape: f32[2,8,32], index: 9, kind: output, shape index: {}]  }
   0x1   :  { %2652 = sst [smem:[#allocation16_spill]] %s2639_s1 }
   0x2   :  { %2653 = sst [smem:[#allocation17_spill]] %s2640_s2 }
   0x3   :  { %2654 = sst [smem:[#allocation18_spill]] %s2641_s3 }
   0x4   :  { %2655 = sst [smem:[#allocation19_spill]] %s2642_s4 }
   0x5   :  { %14 = vsyncpa [#allocation3], 0 }
   0x6   :  { %16 = vsyncpa [#allocation3 + $0x1], 0 }
   0x7   :  { %17 = vsyncpa [#allocation6], 0 }
   0x8   :  { %18 = vsyncpa [#allocation9], 0 }
   0x9   :  { %19 = vsyncpa [#allocation4], 0 }
   0xa   :  { %21 = vsyncpa [#allocation4 + $0x1], 0  ;;  %s2298_s30 = smov 0   ;;  %s2300_s10 = smov 0  }
   0xb   :  { %s2302_s11 = smov 0   ;;  %s2304_s12 = smov 0  }
   0xc LB: > { %s2235_s13 = smov [#allocation5]   ;;  %s2319_s15 = sadd.s32 4294967295, %s2233_s12   ;;  %s2233_s12 = sphi %s2304_s12, %s2679_s12   ;;  %s2229_s11 = sphi %s2302_s11, %s2678_s11   ;;  %s2225_s10 = sphi %s2300_s10, %s2677_s10   ;;  %s2221_s30 = sphi %s2298_s30, %s2676_s30  }
   0xd   : > { %s264_s14 = sshll.u32 %s2235_s13, 4  ;;  %p1745_p0 = scmp.ge.s32.totalorder %s2233_s12, 1  ;;  %s265_s14 = int_to_ptr.vmem [resolvable:$true] %s264_s14 }
   0xe   : > { %p2648_p1 = scmp.eq.s32.totalorder %s2319_s15, 0  ;;  %p252_p2 = scmp.lt.s32.totalorder %s2233_s12, 3 }
   0xf   : > { %s2236_s17 = smov [#allocation8]   ;;  %s2237_s20 = smov [#allocation7]  }
  0x10   : > { %p2324_p3 = pnand %p1745_p0, %p252_p2  ;;  %s290_s18 = sshll.u32 %s2236_s17, 4  ;;  %s2337_s18 = int_to_ptr.vmem [resolvable:$true] %s290_s18 }
  0x11   : > { %s277_s21 = sshll.u32 %s2237_s20, 4  ;;  %s2040_s22 = scalar_lea.vmem %s265_s14, 512  ;;  %s2339_s21 = int_to_ptr.vmem [resolvable:$true] %s277_s21 }
  0x12   : > { %s2656_s16 = scalar_select %p2324_p3, 1, 0 }
  0x13   : > { %p1939_p5 = pneg %p2324_p3  ;;  %p2041_p8 = scmp.ne.s32.totalorder %s265_s14, %s2040_s22 }
  0x14   : > { %p2048_p11 = scmp.lt.s32.totalorder %s265_s14, %s265_s14  ;;  %p2049_p12 = scmp.lt.s32.totalorder %s2040_s22, %s2040_s22 }
  0x15   : > { %p2333_p6 = pnand %p1939_p5, %p2648_p1 }
  0x16   : > { %p2050_p13 = por %p2049_p12, %p2048_p11 }
  0x17   : > { %p2031_p7 = pneg %p2333_p6 }
  0x19   : > { %p2043_p9 = pnand %p2041_p8, %p2031_p7 }
  0x1b   : > { %p2044_p10 = pneg %p2043_p9 }
  0x1d   : > { %p2051_p0 = pnand %p2050_p13, %p2044_p10 }
  0x1f   : > { %2054 = shalt.err (!%p2051_p0)
}
  0x20   : > { %s2238_s23 = smov 128   ;;  %s2239_s24 = smov 8  }
  0x21   : > { %s2658_s1 = sld [smem:[#allocation16_spill]]  ;;  %s2066_s27 = scalar_lea.vmem %s2337_s18, 512 }
  0x22   : > { %p2067_p2 = scmp.ne.s32.totalorder %s2337_s18, %s2066_s27  ;;  %p2074_p9 = scmp.lt.s32.totalorder %s2337_s18, %s2337_s18 }
  0x23   : > { %p2075_p10 = scmp.lt.s32.totalorder %s2066_s27, %s2066_s27 }
  0x24   : > { %p2069_p5 = pnand %p2067_p2, %p2031_p7 }
  0x25   : > { %p2076_p11 = por %p2075_p10, %p2074_p9 }
  0x26   : > { %p2070_p8 = pneg %p2069_p5 }
  0x27   : > { %1942 = dma.hbm_to_vmem [thread:$0]  (!%p2333_p6), %s2658_s1, 512, %s265_s14, [#allocation6], %s2238_s23, %s2238_s23, %s2239_s24  }
  0x28   : > { %p2077_p12 = pnand %p2076_p11, %p2070_p8 }
  0x2a   : > { %2080 = shalt.err (!%p2077_p12)
}
  0x2b   : > { %s2659_s3 = sld [smem:[#allocation18_spill]]  ;;  %s2092_s13 = scalar_lea.vmem %s2339_s21, 512 }
  0x2c   : > { %p2093_p13 = scmp.ne.s32.totalorder %s2339_s21, %s2092_s13  ;;  %p2100_p5 = scmp.lt.s32.totalorder %s2339_s21, %s2339_s21 }
  0x2d   : > { %p2101_p8 = scmp.lt.s32.totalorder %s2092_s13, %s2092_s13 }
  0x2e   : > { %p2095_p0 = pnand %p2093_p13, %p2031_p7 }
  0x2f   : > { %p2102_p9 = por %p2101_p8, %p2100_p5 }
  0x30   : > { %p2096_p2 = pneg %p2095_p0 }
  0x31   : > { %1948 = dma.hbm_to_vmem [thread:$0]  (!%p2333_p6), %s2659_s3, 512, %s2337_s18, [#allocation9], %s2238_s23, %s2238_s23, %s2239_s24  }
  0x32   : > { %p2103_p10 = pnand %p2102_p9, %p2096_p2 }
  0x34   : > { %2106 = shalt.err (!%p2103_p10)
}
  0x35   : > { %s2660_s2 = sld [smem:[#allocation17_spill]]  ;;  %s2240_s18 = smov [#allocation10]  }
  0x36   : > { %s303_s20 = sshll.u32 %s2240_s18, 4  ;;  %s304_s20 = int_to_ptr.vmem [resolvable:$true] %s303_s20 }
  0x37   : > { %s2118_s22 = scalar_lea.vmem %s304_s20, 512  ;;  %p2126_p0 = scmp.lt.s32.totalorder %s304_s20, %s304_s20 }
  0x38   : > { %p2119_p11 = scmp.ne.s32.totalorder %s304_s20, %s2118_s22  ;;  %p2127_p2 = scmp.lt.s32.totalorder %s2118_s22, %s2118_s22 }
  0x3a   : > { %p2121_p12 = pnand %p2119_p11, %p2031_p7  ;;  %p2128_p5 = por %p2127_p2, %p2126_p0 }
  0x3b   : > { %1945 = dma.hbm_to_vmem [thread:$0]  (!%p2333_p6), %s2660_s2, 512, %s2339_s21, [#allocation6], %s2238_s23, %s2238_s23, %s2239_s24  }
  0x3c   : > { %p2122_p13 = pneg %p2121_p12 }
  0x3e   : > { %p2129_p8 = pnand %p2128_p5, %p2122_p13 }
  0x40   : > { %2132 = shalt.err (!%p2129_p8)
}
  0x41   : > { %s2661_s4 = sld [smem:[#allocation19_spill]]  ;;  %s1744_s19 = sadd.s32 4294967294, %s2233_s12  }
  0x42   : > { %s2399_s26 = sadd.s32 1, %s2233_s12   ;;  %s34_s28 = sadd.s32 1, %s2229_s11 }
  0x43   : > { %s31_s27 = ssub.s32 %s2233_s12, %s2399_s26  ;;  %p41_p9 = scmp.ne.s32.totalorder %s2229_s11, %s2225_s10 }
  0x44   : > { %p32_p7 = scmp.eq.s32.totalorder %s31_s27, 0  ;;  %p42_p10 = scmp.eq.s32.totalorder %s2233_s12, 0 }
  0x45   : > { %p47_p11 = scmp.ne.s32.totalorder %s2225_s10, %s2221_s30  ;;  %p239_p13 = scmp.eq.s32.totalorder %s2319_s15, 1 }
  0x46   : > { %s2410_s29 = scalar_select %p32_p7, %s2229_s11, %s34_s28  }
  0x47   : > { %1951 = dma.hbm_to_vmem [thread:$0]  (!%p2333_p6), %s2661_s4, 512, %s304_s20, [#allocation9], %s2238_s23, %s2238_s23, %s2239_s24  }
  0x48   : > { %p2412_p12 = por %p42_p10, %p41_p9  ;;  %p2418_p6 = por %p2648_p1, %p47_p11 }
  0x49   : > { %p245_p0 = scmp.eq.s32.totalorder %s1744_s19, 1  ;;  %p1964_p2 = scmp.lt.s32.totalorder %s2233_s12, 2 }
  0x4a   : > { %s2663_s23 = scalar_select %p2418_p6, 1, 0 }
  0x4b   : > { %s329_s24 = sand.u32 1, %s2229_s11   ;;  %p2425_p5 = por %p239_p13, %p41_p9 }
  0x4c   : > { %p2429_p8 = por %p245_p0, %p47_p11  ;;  %s1751_s18 = sshll.u32 %s329_s24, 3 }
  0x4d   : > { %s2664_s14 = scalar_select %p2425_p5, 1, 0 }
  0x4e   : > { %s2665_s17 = scalar_select %p2429_p8, 1, 0 }
  0x4f   : > { %s1752_s20 = sshll.u32 %s2233_s12, 7  ;;  %s333_s19 = scalar_lea.vmem [#allocation2], %s1751_s18 }
  0x50   : > { %s2437_s25 = scalar_lea.hbm %s2638_s0, %s1752_s20  ;;  %s340_s27 = sshll.u32 %s333_s19, 4  ;;  %s341_s27 = int_to_ptr.vmem [resolvable:$true] %s340_s27 }
  0x51   : > { %p2441_p7 = pnand %p1964_p2, %p2412_p12  ;;  %s330_s1 = scalar_lea.sflag [#allocation3], %s329_s24 }
  0x52   : > { %s2133_s2 = scalar_lea.hbm %s2437_s25, 128  ;;  %s2138_s21 = scalar_lea.hbm %s2638_s0, 256 }
  0x53   : > { %p2134_p9 = scmp.ne.s32.totalorder %s2437_s25, %s2133_s2  ;;  %p2135_p10 = pneg %p2441_p7 }
  0x54   : > { %p2139_p0 = scmp.lt.s32.totalorder %s2437_s25, %s2638_s0  ;;  %p2140_p12 = scmp.lt.s32.totalorder %s2138_s21, %s2133_s2 }
  0x55   : > { %p2136_p11 = pnand %p2135_p10, %p2134_p9 }
  0x56   : > { %p2141_p2 = por %p2140_p12, %p2139_p0 }
  0x57   : > { %p2137_p13 = pneg %p2136_p11 }
  0x59   : > { %p2142_p4 = pnand %p2141_p2, %p2137_p13 }
  0x5b   : > { %2145 = shalt.err (!%p2142_p4)
}
  0x5c   : > { %s2146_s13 = scalar_lea.vmem %s341_s27, 128  ;;  %s2241_s24 = smov [#allocation2]  }
  0x5d   : > { %p2147_p1 = scmp.ne.s32.totalorder %s341_s27, %s2146_s13  ;;  %s2151_s3 = sshll.u32 %s2241_s24, 4  ;;  %s2152_s3 = int_to_ptr.vmem [resolvable:$false] %s2151_s3 }
  0x5e   : > { %s2153_s4 = scalar_lea.vmem %s2152_s3, 256  ;;  %p2154_p9 = scmp.lt.s32.totalorder %s341_s27, %s2152_s3 }
  0x5f   : > { %p2149_p8 = pnand %p2147_p1, %p2135_p10  ;;  %p2155_p11 = scmp.lt.s32.totalorder %s2153_s4, %s2146_s13 }
  0x61   : > { %p2150_p5 = pneg %p2149_p8  ;;  %p2156_p6 = por %p2155_p11, %p2154_p9 }
  0x63   : > { %p2157_p3 = pnand %p2156_p6, %p2150_p5 }
  0x65   : > { %2160 = shalt.err (!%p2157_p3)
}
  0x66   : > { %1955 = dma.hbm_to_vmem [thread:$0]  (!%p2441_p7), %s2437_s25, 128, %s341_s27, %s330_s1  }
  0x67   : > { %p2667_p13 = scmp.ne.s32.totalorder %s2656_s16, 0 }
  0x68   : > { %s2462_s2 = sand.u32 (!%p2667_p13), 1, %s2225_s10   ;;  %p2668_p1 = scmp.ne.s32.totalorder (!%p2667_p13), %s2663_s23, 0 }
  0x69   : > { %349 = sbr.rel (%p2667_p13) target bundleno = 2566 (0xa06), region = 56  ;;  %s1754_s20 = sshll.u32 (!%p2667_p13), %s2462_s2, 3 }
  0x6a   : > { %s352_s3 = scalar_lea.sflag (!%p2667_p13), [#allocation3], %s2462_s2  ;;  %s2468_s4 = scalar_lea.vmem (!%p2667_p13), [#allocation2], %s1754_s20 }
  0x6e   : > { %2204 = dma.done.wait (%p2668_p1), %s352_s3, 128  }
  0x6f   : > { %2206 = vsyncadd (%p2668_p1), %s352_s3, 4294967168  ;;  %p2669_p3 = scmp.eq.s32.totalorder %s2319_s15, 0 }
  0x71   : > { %2208 = dma.done.wait (%p2669_p3), [#allocation6], 1024   ;;  %p2670_p4 = pmov %p2669_p3 }
  0x72   : > { %p2671_p6 = pmov %p2669_p3 }
  0x73   : > { %2210 = vsyncadd (%p2670_p4), [#allocation6], 4294966272 }
  0x74   : > { %2212 = dma.done.wait (%p2671_p6), [#allocation9], 1024   ;;  %p2672_p5 = pmov %p2669_p3 }
  0x75   : > { %v2242_v0 = vmov 0.0   ;;  %vm2243_vm0 = vmmov 0   ;;  %v495_v1 = vld [vmem:[#allocation7 + $0x18] sm:$0xff]  ;;  %v494_v3 = vld [vmem:[#allocation7 + $0x10] sm:$0xff]  ;;  %v493_v5 = vld [vmem:[#allocation7 + $0x8] sm:$0xff]  ;;  %vm418_vm1 = vcmask 261120  }
  0x76   : > { %2214 = vsyncadd (%p2672_p5), [#allocation9], 4294966272  ;;  %1837 = vmatprep.subr.mxu1 %v2242_v0  ;;  %1826 = vmatprep.subr.mxu0 %v2242_v0  ;;  %v410_v2 = vld [vmem:[#allocation5 + $0x18] sm:$0xff]  ;;  %v409_v4 = vld [vmem:[#allocation5 + $0x10] sm:$0xff]  ;;  %vm658_vm2 = vcmask 64512   ;;  %s2244_s27 = smov 120  }
  0x77   : > { %1845 = vmatprep.mubr.msk.f32.mxu1 %vm2243_vm0, %v2242_v0  ;;  %1834 = vmatprep.mubr.msk.f32.mxu0 %vm2243_vm0, %v2242_v0  ;;  %v408_v6 = vld [vmem:[#allocation5 + $0x8] sm:$0xff]  ;;  %v492_v7 = vld [vmem:[#allocation7] sm:$0xff]  ;;  %v406_v9 = vld [vmem:[%s2468_s4] sm:$0xff]  ;;  %s2245_s21 = smov 112   ;;  %s2246_s18 = smov 104  }
  0x78   : > { %1838 = vmatpush3.msra.mxu1 %v495_v1  ;;  %1827 = vmatpush3.msra.mxu0 %v410_v2  ;;  %v407_v8 = vld [vmem:[#allocation5] sm:$0xff]  ;;  %v576_v10 = vld [vmem:[#allocation8 + $0x18] sm:$0xff]  ;;  %v575_v11 = vld [vmem:[#allocation8 + $0x10] sm:$0xff]  ;;  %s1784_s24 = sshll.u32 %s2319_s15, 7  ;;  %s405_s3 = scalar_lea.vmem [#allocation11], %s1754_s20 }
  0x79   : > { %1839 = vmatprep.subr.mxu1 %v2242_v0  ;;  %1828 = vmatprep.subr.mxu0 %v2242_v0  ;;  %v574_v12 = vld [vmem:[#allocation8 + $0x8] sm:$0xff]  ;;  %v573_v13 = vld [vmem:[#allocation8] sm:$0xff]  ;;  %v1762_v14 = vld [vmem:[%s2644_s6] ss:$0 sm:$0xff]  ;;  %s1636_s4 = sshll.u32 %s405_s3, 4  ;;  %s1634_s23 = scalar_lea.hbm %s2647_s9, %s1784_s24  ;;  %s1637_s4 = int_to_ptr.vmem [resolvable:$true] %s1636_s4 }
  0x7a   : > { %1840 = vmatpush3.msra.mxu1 %v494_v3  ;;  %1829 = vmatpush3.msra.mxu0 %v409_v4  ;;  %v1760_v15 = vld [vmem:[%s2643_s5] ss:$0 sm:$0xff]  ;;  %v655_v49 = vld [vmem:[#allocation10 + $0x8] sm:$0xff]  ;;  %v654_v54 = vld [vmem:[#allocation10] sm:$0xff]  ;;  %s1623_s25 = scalar_lea.sflag [#allocation4], %s2462_s2  ;;  %p2673_p7 = scmp.ne.s32.totalorder %s2664_s14, 0 }
  0x7b   : > { %1841 = vmatprep.subr.mxu1 %v2242_v0  ;;  %1830 = vmatprep.subr.mxu0 %v2242_v0  ;;  %v1764_v22 = vld [vmem:[%s2645_s7] ss:$0 sm:$0xff]  ;;  %s2247_s15 = smov [#allocation11]  }
  0x7c   : > { %1842 = vmatpush3.msra.mxu1 %v493_v5  ;;  %1831 = vmatpush3.msra.mxu0 %v408_v6  ;;  %s2165_s28 = sshll.u32 %s2247_s15, 4  ;;  %s2166_s28 = int_to_ptr.vmem [resolvable:$false] %s2165_s28 }
  0x7d   : > { %1843 = vmatprep.subr.mxu1 %v2242_v0  ;;  %1832 = vmatprep.subr.mxu0 %v2242_v0  ;;  %s2167_s20 = scalar_lea.vmem %s2166_s28, 256  ;;  %p2168_p12 = scmp.lt.s32.totalorder %s1637_s4, %s2166_s28 }
  0x7e   : > { %1844 = vmatpush3.msra.mxu1 %v492_v7  ;;  %1833 = vmatpush3.msra.mxu0 %v407_v8 }
  0x7f   : > { %1846 = vmatmul.mubr.msk.f32.vlgmr.msra.gmra.mxu1 %vm418_vm1, %v406_v9  ;;  %1835 = vmatmul.mubr.msk.f32.vlgmr.msra.gmra.mxu0 %vm418_vm1, %v406_v9 }
  0x80   : > { %1859 = vmatprep.subr.mxu1 %v2242_v0  ;;  %1861 = vmatprep.mubr.msk.f32.mxu1 %vm2243_vm0, %v2242_v0 }
  0x81   : > { %1848 = vmatprep.subr.mxu0 %v2242_v0  ;;  %1856 = vmatprep.mubr.msk.f32.mxu0 %vm2243_vm0, %v2242_v0 }
  0x82   : > { %1849 = vmatpush3.msra.mxu0 %v576_v10 }
  0x83   : > { %1850 = vmatprep.subr.mxu0 %v2242_v0 }
  0x84   : > { %1851 = vmatpush3.msra.mxu0 %v575_v11 }
  0x85   : > { %1852 = vmatprep.subr.mxu0 %v2242_v0 }
  0x86   : > { %1853 = vmatpush3.msra.mxu0 %v574_v12 }
  0x87   : > { %1854 = vmatprep.subr.mxu0 %v2242_v0 }
  0x88   : > { %1855 = vmatpush3.msra.mxu0 %v573_v13 }
  0x89   : > { %1857 = vmatmul.mubr.msk.f32.vlgmr.msra.gmra.mxu0 %vm418_vm1, %v406_v9  ;;  %1869 = vmatprep.subr.mxu0 %v2242_v0 }
  0x8a   : > { %1871 = vmatprep.mubr.msk.f32.mxu0 %vm2243_vm0, %v2242_v0 }
 0x13f   : > { %v569_v16 = vpop.f32.mrf.mxu1  ;;  %v488_v17 = vpop.f32.mrf.mxu0 }
 0x140   : > { %v2516_v18 = vadd.f32 %v1762_v14, %v569_v16  ;;  %v2518_v19 = vadd.f32 %v1760_v15, %v488_v17  ;;  %v656_v17 = vld [vmem:[#allocation10 + $0x10] sm:$0xff] }
 0x141   : > { %v1847_v20 = vpop.f32.mrf.mxu1  ;;  %v1836_v21 = vpop.f32.mrf.mxu0 }
 0x142   : > { %822 = vrot.lane.b32.xlu0 %v2516_v18, %s2244_s27  ;;  %1860 = vmatpush3.xpose.msk.msra.mxu1 %vm658_vm2, %v2516_v18 }
 0x143   : > { %1864 = vmatprep.subr.mxu1 %v2242_v0 }
 0x145   : > { %1862 = vmatmul.mubr.msk.f32.vlgmr.msra.gmra.mxu1 %vm658_vm2, %v2518_v19 }
 0x146   : > { %820 = vrot.lane.b32.xlu0 %v2518_v19, %s2244_s27  ;;  %1866 = vmatprep.mubr.msk.f32.mxu1 %vm2243_vm0, %v2242_v0 }
 0x149   : > { %v650_v23 = vpop.f32.mrf.mxu0 }
 0x14a   : > { %v2534_v24 = vadd.f32 %v1764_v22, %v650_v23 }
 0x14b   : > { %v1858_v25 = vpop.f32.mrf.mxu0 }
 0x14c   : > { %1865 = vmatpush3.msra.mxu1 %v2534_v24 }
 0x14d   : > { %1874 = vmatprep.subr.mxu1 %v2242_v0 }
 0x1b4   : > { %v823_v26 = vpop.permute.xlu0 %822 }
 0x1b5   : > { %1870 = vmatpush3.xpose.msk.msra.mxu0 %vm658_vm2, %v823_v26 }
 0x1b6   : > { %1879 = vmatprep.subr.mxu0 %v2242_v0 }
 0x1b8   : > { %v821_v27 = vpop.permute.xlu0 %820 }
 0x1b9   : > { %1872 = vmatmul.mubr.msk.f32.vlgmr.msra.gmra.mxu0 %vm658_vm2, %v821_v27 }
 0x1ba   : > { %1881 = vmatprep.mubr.msk.f32.mxu0 %vm2243_vm0, %v2242_v0  ;;  %1880 = vmatpush3.msra.mxu0 %v655_v49 }
 0x1bb   : > { %1889 = vmatprep.subr.mxu0 %v2242_v0 }
 0x205   : > { %v731_v28 = vpop.f32.mrf.mxu1 }
 0x206   : > { %v735_v29 = vmul.f32 0.35355338, %v731_v28 }
 0x207   : > { %v1863_v30 = vpop.f32.mrf.mxu1 }
 0x208   : > { %v736_v31 = vsel %vm658_vm2, %v735_v29, -inf  ;;  %v657_v30 = vld [vmem:[#allocation10 + $0x18] sm:$0xff] }
 0x209   : > { %737 = vmax.xlane.f32.xlu1 %v736_v31 }
 0x279   : > { %v894_v32 = vpop.f32.mrf.mxu0 }
 0x27a   : > { %v898_v33 = vmul.f32 0.35355338, %v894_v32 }
 0x27b   : > { %v1873_v34 = vpop.f32.mrf.mxu0 }
 0x27c   : > { %v899_v35 = vsel %vm658_vm2, %v898_v33, -inf }
 0x27d   : > { %900 = vmax.xlane.f32.xlu1 %v899_v35 }
 0x292   : > { %v738_v36 = vpop.xlane.xlu1 %737 }
 0x293   : > { %v739_v37 = vsub.f32 %v735_v29, %v738_v36 }
 0x295   : > { %v740_v38 = vmul.f32 1.442695, %v739_v37 }
 0x297   : > { %2013 = vpow2.f32 %v740_v38 }
 0x2a4   : > { %v2014_v39 = vpop.eup %2013 }
 0x2a5   : > { %v742_v40 = vsel %vm658_vm2, %v2014_v39, 0.0 }
 0x2a6   : > { %743 = vadd.xlane.f32.xlu0 %v742_v40  ;;  %v1782_v40 = vld [vmem:[%s2646_s8] ss:$0 sm:$0xff] }
 0x2bc   : > { %1223 = vrot.lane.b32.xlu0 %v2534_v24, %s2245_s21 }
 0x306   : > { %v901_v41 = vpop.xlane.xlu1 %900 }
 0x307   : > { %v902_v42 = vsub.f32 %v898_v33, %v901_v41 }
 0x309   : > { %v903_v43 = vmul.f32 1.442695, %v902_v42 }
 0x30b   : > { %2015 = vpow2.f32 %v903_v43 }
 0x318   : > { %v2016_v44 = vpop.eup %2015 }
 0x319   : > { %v905_v45 = vsel %vm658_vm2, %v2016_v44, 0.0 }
 0x31a   : > { %906 = vadd.xlane.f32.xlu1 %v905_v45 }
 0x32b   : > { %911 = vrot.lane.b32.xlu1 %v2534_v24, %s2244_s27  ;;  %s2161_s27 = scalar_lea.vmem %s1637_s4, 128 }
 0x32c   : > { %p2162_p8 = scmp.ne.s32.totalorder %s1637_s4, %s2161_s27  ;;  %p2169_p2 = scmp.lt.s32.totalorder %s2167_s20, %s2161_s27 }
 0x32e   : > { %p2163_p10 = pnand %p2162_p8, %p2673_p7  ;;  %p2170_p9 = por %p2169_p2, %p2168_p12 }
 0x32f   : > { %v744_v46 = vpop.xlane.xlu0 %743  ;;  %1135 = vrot.lane.b32.xlu1 %v2516_v18, %s2245_s21 }
 0x330   : > { %2017 = vrcp.f32 %v744_v46  ;;  %p2164_p0 = pneg %p2163_p10 }
 0x332   : > { %p2171_p11 = pnand %p2170_p9, %p2164_p0 }
 0x333   : > { %1133 = vrot.lane.b32.xlu1 %v2518_v19, %s2245_s21  ;;  %v1224_v56 = vpop.permute.xlu0 %1223 }
 0x33d   : > { %v2018_v47 = vpop.eup %2017 }
 0x33e   : > { %v746_v48 = vmul.f32 %v2018_v47, %v2014_v39 }
 0x340   : > { %1867 = vmatmul.mubr.msk.f32.vlgmr.msra.gmra.mxu1 %vm658_vm2, %v746_v48 }
 0x341   : > { %1876 = vmatprep.mubr.msk.f32.mxu1 %vm2243_vm0, %v2242_v0 }
 0x3a3   : > { %v907_v50 = vpop.xlane.xlu1 %906 }
 0x3a4   : > { %2019 = vrcp.f32 %v907_v50 }
 0x3a7   : > { %v912_v51 = vpop.permute.xlu1 %911 }
 0x3a8   : > { %1875 = vmatpush3.msra.mxu1 %v912_v51 }
 0x3a9   : > { %1884 = vmatprep.subr.mxu1 %v2242_v0 }
 0x3ab   : > { %v1136_v58 = vpop.permute.xlu1 %1135 }
 0x3af   : > { %v1134_v61 = vpop.permute.xlu1 %1133 }
 0x3b1   : > { %v2020_v52 = vpop.eup %2019 }
 0x3b2   : > { %v909_v53 = vmul.f32 %v2020_v52, %v2016_v44 }
 0x3b4   : > { %1877 = vmatmul.mubr.msk.f32.vlgmr.msra.gmra.mxu1 %vm658_vm2, %v909_v53 }
 0x3b5   : > { %1885 = vmatpush3.msra.mxu1 %v654_v54  ;;  %1886 = vmatprep.mubr.msk.f32.mxu1 %vm2243_vm0, %v2242_v0 }
 0x3b6   : > { %1894 = vmatprep.subr.mxu1 %v2242_v0 }
 0x400   : > { %v816_v55 = vpop.f32.mrf.mxu1 }
 0x401   : > { %1887 = vmatmul.mubr.msk.f32.vlgmr.msra.gmra.mxu1 %vm658_vm2, %v816_v55 }
 0x402   : > { %1895 = vmatpush3.msra.mxu1 %v1224_v56  ;;  %v1868_v57 = vpop.f32.mrf.mxu1  ;;  %1896 = vmatprep.mubr.msk.f32.mxu1 %vm2243_vm0, %v2242_v0 }
 0x403   : > { %1904 = vmatprep.subr.mxu1 %v2242_v0 }
 0x474   : > { %v983_v59 = vpop.f32.mrf.mxu1 }
 0x475   : > { %1882 = vmatmul.mubr.msk.f32.vlgmr.msra.gmra.mxu0 %vm658_vm2, %v983_v59 }
 0x476   : > { %1890 = vmatpush3.xpose.msk.msra.mxu0 %vm658_vm2, %v1136_v58  ;;  %v1878_v60 = vpop.f32.mrf.mxu1  ;;  %1891 = vmatprep.mubr.msk.f32.mxu0 %vm2243_vm0, %v2242_v0 }
 0x477   : > { %1899 = vmatprep.subr.mxu0 %v2242_v0 }
 0x479   : > { %1892 = vmatmul.mubr.msk.f32.vlgmr.msra.gmra.mxu0 %vm658_vm2, %v1134_v61 }
 0x47a   : > { %1901 = vmatprep.mubr.msk.f32.mxu0 %vm2243_vm0, %v2242_v0  ;;  %1900 = vmatpush3.msra.mxu0 %v656_v17 }
 0x47b   : > { %1909 = vmatprep.subr.mxu0 %v2242_v0 }
 0x4c1   : > { %v1129_v62 = vpop.f32.mrf.mxu1 }
 0x4c3   : > { %v1888_v63 = vpop.f32.mrf.mxu1 }
 0x535   : > { %v1056_v1 = vpop.f32.mrf.mxu0 }
 0x536   : > { %v1130_v31 = vadd.f32 %v1129_v62, %v1056_v1 }
 0x537   : > { %v1883_v2 = vpop.f32.mrf.mxu0 }
 0x539   : > { %v1207_v3 = vpop.f32.mrf.mxu0 }
 0x53a   : > { %v1211_v4 = vmul.f32 0.35355338, %v1207_v3 }
 0x53b   : > { %v1893_v5 = vpop.f32.mrf.mxu0 }
 0x53c   : > { %v1212_v6 = vsel %vm658_vm2, %v1211_v4, -inf }
 0x53d   : > { %1213 = vmax.xlane.f32.xlu1 %v1212_v6 }
 0x5c6   : > { %v1214_v7 = vpop.xlane.xlu1 %1213 }
 0x5c7   : > { %v1215_v8 = vsub.f32 %v1211_v4, %v1214_v7 }
 0x5c9   : > { %v1216_v9 = vmul.f32 1.442695, %v1215_v8 }
 0x5cb   : > { %2021 = vpow2.f32 %v1216_v9 }
 0x5d8   : > { %v2022_v10 = vpop.eup %2021 }
 0x5d9   : > { %v1218_v11 = vsel %vm658_vm2, %v2022_v10, 0.0 }
 0x5da   : > { %1219 = vadd.xlane.f32.xlu0 %v1218_v11 }
 0x5f0   : > { %1375 = vrot.lane.b32.xlu0 %v2516_v18, %s2246_s18 }
 0x5f4   : > { %1373 = vrot.lane.b32.xlu0 %v2518_v19, %s2246_s18 }
 0x663   : > { %v1220_v12 = vpop.xlane.xlu0 %1219 }
 0x664   : > { %2023 = vrcp.f32 %v1220_v12 }
 0x667   : > { %v1376_v14 = vpop.permute.xlu0 %1375 }
 0x66b   : > { %v1374_v16 = vpop.permute.xlu0 %1373 }
 0x671   : > { %v2024_v13 = vpop.eup %2023 }
 0x672   : > { %v1222_v15 = vmul.f32 %v2024_v13, %v2022_v10 }
 0x674   : > { %1897 = vmatmul.mubr.msk.f32.vlgmr.msra.gmra.mxu1 %vm658_vm2, %v1222_v15 }
 0x675   : > { %1905 = vmatpush3.xpose.msk.msra.mxu1 %vm658_vm2, %v1376_v14  ;;  %1906 = vmatprep.mubr.msk.f32.mxu1 %vm2243_vm0, %v2242_v0 }
 0x676   : > { %1914 = vmatprep.subr.mxu1 %v2242_v0 }
 0x678   : > { %1907 = vmatmul.mubr.msk.f32.vlgmr.msra.gmra.mxu1 %vm658_vm2, %v1374_v16 }
 0x679   : > { %1916 = vmatprep.mubr.msk.f32.mxu1 %vm2243_vm0, %v2242_v0  ;;  %1915 = vmatpush3.msra.mxu1 %v657_v30 }
 0x734   : > { %v1295_v18 = vpop.f32.mrf.mxu1 }
 0x735   : > { %1902 = vmatmul.mubr.msk.f32.vlgmr.msra.gmra.mxu0 %vm658_vm2, %v1295_v18 }
 0x736   : > { %v1898_v19 = vpop.f32.mrf.mxu1  ;;  %1911 = vmatprep.mubr.msk.f32.mxu0 %vm2243_vm0, %v2242_v0 }
 0x738   : > { %v1447_v20 = vpop.f32.mrf.mxu1 }
 0x739   : > { %v1451_v21 = vmul.f32 0.35355338, %v1447_v20 }
 0x73a   : > { %v1908_v22 = vpop.f32.mrf.mxu1 }
 0x73b   : > { %v1452_v23 = vsel %vm658_vm2, %v1451_v21, -inf }
 0x73c   : > { %1453 = vmax.xlane.f32.xlu0 %v1452_v23 }
 0x7c5   : > { %v1454_v25 = vpop.xlane.xlu0 %1453 }
 0x7c6   : > { %v1455_v26 = vsub.f32 %v1451_v21, %v1454_v25 }
 0x7c8   : > { %v1456_v27 = vmul.f32 1.442695, %v1455_v26 }
 0x7ca   : > { %2025 = vpow2.f32 %v1456_v27 }
 0x7d7   : > { %v2026_v28 = vpop.eup %2025 }
 0x7d8   : > { %v1458_v29 = vsel %vm658_vm2, %v2026_v28, 0.0 }
 0x7d9   : > { %1459 = vadd.xlane.f32.xlu1 %v1458_v29 }
 0x7ea   : > { %1463 = vrot.lane.b32.xlu1 %v2534_v24, %s2246_s18 }
 0x7f5   : > { %v1368_v0 = vpop.f32.mrf.mxu0 }
 0x7f6   : > { %v1372_v32 = vadd.f32 %v1368_v0, %v1130_v31 }
 0x7f7   : > { %v1903_v33 = vpop.f32.mrf.mxu0 }
 0x862   : > { %v1460_v34 = vpop.xlane.xlu1 %1459 }
 0x863   : > { %2027 = vrcp.f32 %v1460_v34 }
 0x866   : > { %v1464_v35 = vpop.permute.xlu1 %1463 }
 0x867   : > { %1910 = vmatpush3.msra.mxu0 %v1464_v35 }
 0x870   : > { %v2028_v36 = vpop.eup %2027 }
 0x871   : > { %v1462_v37 = vmul.f32 %v2028_v36, %v2026_v28 }
 0x873   : > { %1912 = vmatmul.mubr.msk.f32.vlgmr.msra.gmra.mxu0 %vm658_vm2, %v1462_v37 }
 0x933   : > { %v1535_v38 = vpop.f32.mrf.mxu0 }
 0x934   : > { %1917 = vmatmul.mubr.msk.f32.vlgmr.msra.gmra.mxu1 %vm658_vm2, %v1535_v38 }
 0x935   : > { %v1913_v24 = vpop.f32.mrf.mxu0 }
 0x9f4   : > { %v1608_v39 = vpop.f32.mrf.mxu1 }
 0x9f5   : > { %v1612_v41 = vadd.f32 %v1608_v39, %v1372_v32 }
 0x9f6   : > { %v1918_v42 = vpop.f32.mrf.mxu1 }
 0x9f7   : > { %v1620_v43 = vadd.f32 %v1782_v40, %v1612_v41 }
 0x9f9   : > { %1621 = vst.msk [vmem:[%s405_s3] sm:$0xff] %vm418_vm1, %v1620_v43 }
 0x9fa   : > { %2174 = shalt.err (!%p2171_p11)
}
 0x9fb   : > { %s2175_s22 = scalar_lea.hbm %s1634_s23, 128  ;;  %s2179_s18 = scalar_lea.hbm %s2647_s9, 256 }
 0x9fc   : > { %p2176_p13 = scmp.ne.s32.totalorder %s1634_s23, %s2175_s22  ;;  %p2180_p4 = scmp.lt.s32.totalorder %s1634_s23, %s2647_s9 }
 0x9fd   : > { %p2181_p6 = scmp.lt.s32.totalorder %s2179_s18, %s2175_s22 }
 0x9fe   : > { %p2177_p1 = pnand %p2176_p13, %p2673_p7 }
 0x9ff   : > { %p2182_p5 = por %p2181_p6, %p2180_p4 }
 0xa00   : > { %p2178_p3 = pneg %p2177_p1 }
 0xa02   : > { %p2183_p8 = pnand %p2182_p5, %p2178_p3 }
 0xa04   : > { %2186 = shalt.err (!%p2183_p8)
}
 0xa05   : > { %1937 = dma.vmem_to_hbm [thread:$0]  (%p2673_p7), %s1637_s4, 128, %s1634_s23, %s1623_s25  }
 0xa06 PF: > { %s1648_s24 = sand.u32 1, %s2221_s30   ;;  %p2674_p10 = scmp.ne.s32.totalorder %s2665_s17, 0 }
 0xa07   : > { %p2675_p0 = scmp.ge.s32.totalorder %s2233_s12, 2  ;;  %s1649_s3 = scalar_lea.sflag [#allocation4], %s1648_s24 }
 0xa09   : > { %p1957_p12 = pnand %p2675_p0, %p2674_p10 }
 0xa0b   : > { %p1958_p2 = pneg %p1957_p12 }
 0xa0d   : > { %2216 = dma.done.wait (%p1958_p2), %s1649_s3, 128  }
 0xa0e   : > { %2218 = vsyncadd (%p1958_p2), %s1649_s3, 4294967168  ;;  %p24_p9 = scmp.ge.s32.totalorder %s2399_s26, 4   ;;  %s2676_s30 = smov %s2225_s10 }
 0xa0f   : > { %s2677_s10 = smov %s2229_s11  ;;  %s2678_s11 = smov %s2410_s29 }
 0xa10   : > { %s2679_s12 = smov %s2399_s26  ;;  %26 = sbr.rel (!%p24_p9) target bundleno = 12 (0xc), region = 117 }
 0xa15   :  { %1654 = vsyncpa [#allocation3], 1 }
 0xa16   :  { %1656 = vsyncpa [#allocation3 + $0x1], 1 }
 0xa17   :  { %1657 = vsyncpa [#allocation6], 1 }
 0xa18   :  { %1658 = vsyncpa [#allocation9], 1 }
 0xa19   :  { %1659 = vsyncpa [#allocation4], 1 }
 0xa1a   :  { %1661 = vsyncpa [#allocation4 + $0x1], 1 }

</bundles_post_ra>
